<compile_context>
chip_gen: v6e
topology: v6e:2x2x1
jax: 0.10.0
libtpu: 0.0.40
codegen_flags: <defaults>
</compile_context>

<pallas_src>
import functools
import math

import jax
import jax.numpy as jnp
from jax import lax
from jax.experimental import pallas as pl
from jax.experimental.pallas import tpu as pltpu

# Matmul operand dtype (accumulation is always f32).
MATMUL_DTYPE = jnp.bfloat16


# ------------------------------------------------------------------ kernel ---
def _gnn_kernel(scal_ref, a_ref, h_ref, u_ref, noise_ref,
                w_edge_ref, b_edge_ref,
                w_ih_in_ref, w_ih_out_ref, b_ih_ref,
                w_hh_ref, b_hh_ref,
                o_ref, *, num_steps, hidden_size, matmul_dtype):
    """One batch chunk; all `num_steps` GRU-gated graph steps run in-kernel.

    Everything is 2-D over the M = TB*N flattened (batch-in-chunk, node) rows:
    the adjacency arrives block-diagonalised, so message passing is a single
    (M, M) @ (M, D+U) MXU matmul per direction.
    """
    f32 = jnp.float32
    mm = matmul_dtype
    D = hidden_size
    M = h_ref.shape[0]

    clip_norm = scal_ref[0]
    sig2 = scal_ref[1] * scal_ref[1]

    # ---- loop-invariant loads / broadcasts (hoisted once per chunk) --------
    a_in, a_out = a_ref[0], a_ref[1]                    # (M, M), matmul dtype
    u = u_ref[...].astype(f32)                          # (M, U), per-row user emb
    u_sq = jnp.sum(u * u, axis=-1, keepdims=True)       # (M, 1)
    w_e_in, w_e_out = w_edge_ref[0], w_edge_ref[1]      # (D+U, D), unsplit
    w_ih_in = w_ih_in_ref[...]                          # (D, 3D) fused gates
    w_ih_out = w_ih_out_ref[...]                        # (D, 3D)
    w_hh = w_hh_ref[...]                                # (D, 3D)
    b_e_in = jnp.broadcast_to(b_edge_ref[0], (M, D))    # Linear bias + b_iah
    b_e_out = jnp.broadcast_to(b_edge_ref[1], (M, D))   # Linear bias + b_oah
    b_ih = jnp.broadcast_to(b_ih_ref[...], (M, 3 * D))
    b_hh = jnp.broadcast_to(b_hh_ref[...], (M, 3 * D))

    def step_fn(s, hidden):
        # --- H_bar = F.normalize([hidden | user], dim=-1) * clip_norm -------
        sumsq = jnp.sum(hidden * hidden, axis=-1, keepdims=True) + u_sq
        scale = clip_norm * lax.rsqrt(jnp.maximum(sumsq, 1e-24))     # (M, 1)
        hbar = hidden * scale                                        # (M, D)
        hfull = jnp.concatenate([hbar, u * scale], axis=-1).astype(mm)

        # --- message passing: one (M, M) @ (M, D+U) matmul per direction ----
        x_in = jnp.dot(a_in, hfull, preferred_element_type=f32)
        x_out = jnp.dot(a_out, hfull, preferred_element_type=f32)

        # --- + sigma^2 * N(0,1), then edge Linear on the full D+U width -----
        xn_in = (x_in + sig2 * noise_ref[s, 0]).astype(mm)
        xn_out = (x_out + sig2 * noise_ref[s, 1]).astype(mm)
        in_in = jnp.dot(xn_in, w_e_in, preferred_element_type=f32) + b_e_in
        in_out = jnp.dot(xn_out, w_e_out, preferred_element_type=f32) + b_e_out

        # --- GRU gates: per-source fused (D, 3D) weights, (M, 3D) gi / gh ---
        gi = (jnp.dot(in_in.astype(mm), w_ih_in, preferred_element_type=f32)
              + jnp.dot(in_out.astype(mm), w_ih_out, preferred_element_type=f32)
              + b_ih)
        gh = jnp.dot(hbar.astype(mm), w_hh, preferred_element_type=f32) + b_hh

        # consume the r-gate before touching the i/n slices (vreg pressure)
        resetgate = jax.nn.sigmoid(gi[:, :D] + gh[:, :D])
        newgate = jnp.tanh(gi[:, 2 * D:] + resetgate * gh[:, 2 * D:])
        inputgate = jax.nn.sigmoid(gi[:, D:2 * D] + gh[:, D:2 * D])
        # recurrent state is the normalized hidden, as in the reference
        return hbar + inputgate * (newgate - hbar)

    hidden = h_ref[...].astype(f32)                     # (M, D)
    if num_steps <= 2:
        for s in range(num_steps):                      # short: static unroll
            hidden = step_fn(s, hidden)
    else:                                               # long: bound live ranges
        hidden = lax.fori_loop(0, num_steps, step_fn, hidden)

    o_ref[...] = hidden.astype(o_ref.dtype)


# ----------------------------------------------------------------- wrapper ---
def _choose_chunk(B, N, D, U, num_steps, itemsize,
                  target_m=256, vmem_budget=24 << 20):
    """Batch-chunk size TB.  M = TB*N targets the MXU edge (256); at least two
    grid programs are kept whenever B >= 2 (both v7x TensorCores get work);
    the per-chunk block footprint is capped so the double-buffered pipeline
    stays well inside v7x's 64 MiB physical VMEM."""
    tb = max(1, min(B, -(-target_m // N)))
    if B >= 2:
        tb = min(tb, max(1, B // 2))          # >= 2 chunks for v7x dual-TC

    def footprint(t):
        m = t * N
        blocks = (2 * m * m * itemsize                  # block-diag A (2 dirs)
                  + 2 * m * D * 4                       # hidden in + out
                  + m * U * 4
                  + num_steps * 2 * m * (D + U) * 4)    # noise
        interm = 24 * m * max(3 * D, D + U) * 4         # live f32 intermediates
        return 2 * blocks + interm                      # x2: double buffering

    while tb > 1 and footprint(tb) > vmem_budget:
        tb -= 1
    while tb > 1 and B % tb:
        tb -= 1
    if tb < B and (tb * N) % 8:
        tb = B          # keep the second-to-last block dim (8,128)-legal
    return tb


def gnn_forward(A, hidden0, user_hidden, clip_norm, sigma, noise, weights, *,
                num_steps=1, matmul_dtype=MATMUL_DTYPE):
    B, N, D = hidden0.shape
    U = user_hidden.shape[-1]
    itemsize = jnp.dtype(matmul_dtype).itemsize
    TB = _choose_chunk(B, N, D, U, num_steps, itemsize)
    nc = B // TB
    M = TB * N

    # Block-diagonal adjacency per chunk -> message passing is a single
    # (M, M) @ (M, D+U) matmul per direction with full-K MXU utilization.
    # TODO(synk): for large N (>=128) skip block-diagonalisation and instead
    # tile the adjacency K dim with a reduction grid axis (mandatory on v7x
    # before the (M, M) blocks blow the 64 MiB VMEM budget).
    def block_diag(Ax):                                  # (B,N,N) -> (B*N, M)
        a = Ax.reshape(nc, TB, N, N).astype(matmul_dtype)
        eye = jnp.eye(TB, dtype=matmul_dtype)
        return jnp.einsum('ctnm,ts->ctnsm', a, eye).reshape(nc * M, M)

    a_bd = jnp.stack([block_diag(A[:, :, :N]), block_diag(A[:, :, N:2 * N])])

    hidden_flat = hidden0.reshape(B * N, D).astype(jnp.float32)
    u_exp = jnp.broadcast_to(user_hidden[:, None, :].astype(jnp.float32),
                             (B, N, U)).reshape(B * N, U)
    noise = noise.reshape(num_steps, 2, B * N, D + U).astype(jnp.float32)

    w_edge, b_edge, w_ih_in, w_ih_out, b_ih, w_hh, b_hh = weights
    scal = jnp.stack([jnp.asarray(clip_norm, jnp.float32),
                      jnp.asarray(sigma, jnp.float32)])

    def chunked(shape):
        nd = len(shape)

        def imap(c):
            idx = [0] * nd
            idx[nd - 2] = c          # chunk axis is always second-to-last here
            return tuple(idx)

        return pl.BlockSpec(shape, imap)

    def shared(shape):
        # TODO(synk): single-buffer these resident weights with
        # pipeline_mode=pl.Buffered(1) once verified on all target runtimes.
        nd = len(shape)
        return pl.BlockSpec(shape, lambda c: (0,) * nd)

    # VMEM budget: double-buffered per-chunk blocks + resident weights + live
    # f32 intermediates of one step; clamped to <=48 MiB so it also leaves
    # headroom inside v7x's 64 MiB physical VMEM.
    block_bytes = (2 * M * M * itemsize + 2 * M * D * 4 + M * U * 4
                   + num_steps * 2 * M * (D + U) * 4)
    weight_bytes = (2 * (D + U) * D + 3 * D * 3 * D) * itemsize + 8 * D * 4
    interm_bytes = 24 * M * max(3 * D, D + U) * 4
    vmem_limit = int(min(max(2 * (2 * block_bytes + 2 * weight_bytes)
                             + interm_bytes, 16 << 20), 48 << 20))

    kernel = functools.partial(_gnn_kernel, num_steps=num_steps,
                               hidden_size=D, matmul_dtype=matmul_dtype)

    out = pl.pallas_call(
        kernel,
        out_shape=jax.ShapeDtypeStruct((B * N, D), jnp.float32),
        grid=(nc,),
        in_specs=[
            pl.BlockSpec(memory_space=pltpu.SMEM),       # [clip_norm, sigma]
            chunked((2, M, M)),                          # block-diag A_in/A_out
            chunked((M, D)),                             # hidden (aliased to out)
            chunked((M, U)),                             # user hidden, per row
            chunked((num_steps, 2, M, D + U)),           # host Gaussian noise
            shared((2, D + U, D)),                       # unsplit edge weights
            shared((2, 1, D)),                           # edge bias + b_iah/b_oah
            shared((D, 3 * D)),                          # w_ih rows for in_in
            shared((D, 3 * D)),                          # w_ih rows for in_out
            shared((1, 3 * D)),                          # b_ih (gate-fused)
            shared((D, 3 * D)),                          # w_hh (gate-fused)
            shared((1, 3 * D)),                          # b_hh
        ],
        out_specs=chunked((M, D)),
        input_output_aliases={2: 0},                     # hidden -> output buffer
        compiler_params=pltpu.CompilerParams(
            dimension_semantics=("parallel",),
            vmem_limit_bytes=vmem_limit),
    )(scal, a_bd, hidden_flat, u_exp, noise,
      w_edge, b_edge, w_ih_in, w_ih_out, b_ih, w_hh, b_hh)
    return out.reshape(B, N, D)


def prepare_weights(params, matmul_dtype=MATMUL_DTYPE):
    """Re-pack torch-layout parameters into the kernel's fused operands."""
    mm = matmul_dtype
    D = params["w_hh"].shape[1]

    w_ih_t = params["w_ih"].T                           # (2D, 3D)
    w_ih_in = w_ih_t[:D].astype(mm)                     # rows acting on in_in
    w_ih_out = w_ih_t[D:].astype(mm)                    # rows acting on in_out
    w_hh = params["w_hh"].T.astype(mm)                  # (D, 3D)
    b_ih = params["b_ih"][None, :].astype(jnp.float32)  # (1, 3D)
    b_hh = params["b_hh"][None, :].astype(jnp.float32)

    w_edge = jnp.stack([params["w_edge_in"].T,
                        params["w_edge_out"].T]).astype(mm)      # (2, D+U, D)
    b_edge = jnp.stack([params["b_edge_in"] + params["b_iah"],
                        params["b_edge_out"] + params["b_oah"]]
                       )[:, None, :].astype(jnp.float32)         # (2, 1, D)
    return (w_edge, b_edge, w_ih_in, w_ih_out, b_ih, w_hh, b_hh)


@functools.partial(jax.jit, static_argnames=("step",))
def sequence_graph_forward(inputs, users, A, clip_norm, sigma, params,
                           noise_key, step=1):
    """SequenceGraph.forward: embedding lookup + `step` GRU-gated graph steps."""
    hidden = jnp.take(params["embedding"], inputs, axis=0)            # (B, N, D)
    user_hidden = jnp.take(params["user_embedding"], users, axis=0)   # (B, U)
    if step <= 0:
        return hidden
    B, N, D = hidden.shape
    U = user_hidden.shape[-1]
    # torch.randn equivalent: fresh N(0,1) per step/direction, drawn on the
    # host (the in-kernel TPU hardware PRNG has no interpret/CPU lowering and
    # would tie the realization to the chunking heuristic) and streamed to the
    # kernel as a chunk-tiled input.
    noise = jax.random.normal(noise_key, (step, 2, B * N, D + U), jnp.float32)
    weights = prepare_weights(params, matmul_dtype=MATMUL_DTYPE)
    return gnn_forward(A, hidden, user_hidden, clip_norm, sigma, noise, weights,
                       num_steps=step, matmul_dtype=MATMUL_DTYPE)


# ------------------------------------------------------------- param setup ---
def init_params(key, n_node, n_user, hidden_size, user_hidden_size):
    """uniform(-stdv, stdv) for every parameter, as in reset_parameters()."""
    D, U = hidden_size, user_hidden_size
    stdv = 1.0 / math.sqrt(D)
    shapes = {
        "embedding": (n_node, D),
        "user_embedding": (n_user, U),
        "w_ih": (3 * D, 2 * D),
        "b_ih": (3 * D,),
        "w_hh": (3 * D, D),
        "b_hh": (3 * D,),
        "b_iah": (D,),
        "b_oah": (D,),
        "w_edge_in": (D, D + U),
        "b_edge_in": (D,),
        "w_edge_out": (D, D + U),
        "b_edge_out": (D,),
    }
    ks = jax.random.split(key, len(shapes))
    return {name: jax.random.uniform(k, shape, jnp.float32, -stdv, stdv)
            for k, (name, shape) in zip(ks, shapes.items())}


if __name__ == "__main__":
    # small, module-consistent shapes
    B, N, D, U = 2, 8, 32, 16         # batch, max_n_node, hiddenSize, userhiddenSize
    n_node, n_user = 20, 10
    clip_norm, sigma = 1.0, 0.1
    step = 1                          # opt.step = 1
    # TODO(synk): user_side_info=True branch (Linear on user features) not exercised;
    #             this script uses the nn.Embedding(users) path.

    key = jax.random.PRNGKey(0)
    kp, ki, ku, ka, kn = jax.random.split(key, 5)

    params = init_params(kp, n_node, n_user, D, U)
    inputs = jax.random.randint(ki, (B, N), 0, n_node)                 # [B, N]
    users = jax.random.randint(ku, (B,), 0, n_user)                    # [B]
    A = jax.random.uniform(ka, (B, N, 2 * N), jnp.float32)             # [B, N, 2N]

    out = sequence_graph_forward(inputs, users, A, clip_norm, sigma, params,
                                 kn, step=step)
    jax.block_until_ready(out)
    assert out.shape == (B, N, D)
    assert bool(jnp.all(jnp.isfinite(out)))
    print("KERNEL_OK")
</pallas_src>

<mosaic_0001>
module attributes {stable_mosaic.version = 11 : i64} {
  func.func @_gnn_kernel(%arg0: i32, %arg1: memref<2xf32, #tpu.memory_space<smem>>, %arg2: memref<2x8x8xbf16, #tpu.memory_space<vmem>>, %arg3: memref<8x32xf32, #tpu.memory_space<vmem>>, %arg4: memref<8x16xf32, #tpu.memory_space<vmem>>, %arg5: memref<1x2x8x48xf32, #tpu.memory_space<vmem>>, %arg6: memref<2x48x32xbf16, #tpu.memory_space<vmem>>, %arg7: memref<2x1x32xf32, #tpu.memory_space<vmem>>, %arg8: memref<32x96xbf16, #tpu.memory_space<vmem>>, %arg9: memref<32x96xbf16, #tpu.memory_space<vmem>>, %arg10: memref<1x96xf32, #tpu.memory_space<vmem>>, %arg11: memref<32x96xbf16, #tpu.memory_space<vmem>>, %arg12: memref<1x96xf32, #tpu.memory_space<vmem>>, %arg13: memref<8x32xf32, #tpu.memory_space<vmem>>) attributes {dimension_semantics = [#tpu.dimension_semantics<parallel>], iteration_bounds = array<i64: 2>, scalar_prefetch = 0 : i64, scratch_operands = 0 : i64, tpu.core_type = #tpu.core_type<tc>, window_params = [{transform_indices = @transform_0, window_bounds = array<i64: 2>}, {transform_indices = @transform_1, window_bounds = array<i64: 2, 8, 8>}, {transform_indices = @transform_2, window_bounds = array<i64: 8, 32>}, {transform_indices = @transform_3, window_bounds = array<i64: 8, 16>}, {transform_indices = @transform_4, window_bounds = array<i64: 1, 2, 8, 48>}, {pipeline_mode = #tpu.pipeline_mode<synchronous>, transform_indices = @transform_5, window_bounds = array<i64: 2, 48, 32>}, {pipeline_mode = #tpu.pipeline_mode<synchronous>, transform_indices = @transform_6, window_bounds = array<i64: 2, 1, 32>}, {pipeline_mode = #tpu.pipeline_mode<synchronous>, transform_indices = @transform_7, window_bounds = array<i64: 32, 96>}, {pipeline_mode = #tpu.pipeline_mode<synchronous>, transform_indices = @transform_8, window_bounds = array<i64: 32, 96>}, {pipeline_mode = #tpu.pipeline_mode<synchronous>, transform_indices = @transform_9, window_bounds = array<i64: 1, 96>}, {pipeline_mode = #tpu.pipeline_mode<synchronous>, transform_indices = @transform_10, window_bounds = array<i64: 32, 96>}, {pipeline_mode = #tpu.pipeline_mode<synchronous>, transform_indices = @transform_11, window_bounds = array<i64: 1, 96>}, {transform_indices = @transform_12, window_bounds = array<i64: 8, 32>}]} {
    %c0 = arith.constant 0 : index
    %0 = memref.load %arg1[%c0] : memref<2xf32, #tpu.memory_space<smem>>
    %c1 = arith.constant 1 : index
    %1 = memref.load %arg1[%c1] : memref<2xf32, #tpu.memory_space<smem>>
    %c1_0 = arith.constant 1 : index
    %2 = memref.load %arg1[%c1_0] : memref<2xf32, #tpu.memory_space<smem>>
    %3 = arith.mulf %1, %2 : f32
    %c0_1 = arith.constant 0 : index
    %c0_2 = arith.constant 0 : index
    %c0_3 = arith.constant 0 : index
    %4 = vector.load %arg2[%c0_1, %c0_2, %c0_3] : memref<2x8x8xbf16, #tpu.memory_space<vmem>>, vector<1x8x8xbf16>
    %5 = vector.shape_cast %4 : vector<1x8x8xbf16> to vector<8x8xbf16>
    %c1_4 = arith.constant 1 : index
    %c0_5 = arith.constant 0 : index
    %c0_6 = arith.constant 0 : index
    %6 = vector.load %arg2[%c1_4, %c0_5, %c0_6] : memref<2x8x8xbf16, #tpu.memory_space<vmem>>, vector<1x8x8xbf16>
    %7 = vector.shape_cast %6 : vector<1x8x8xbf16> to vector<8x8xbf16>
    %c0_7 = arith.constant 0 : index
    %c0_8 = arith.constant 0 : index
    %8 = vector.load %arg4[%c0_7, %c0_8] : memref<8x16xf32, #tpu.memory_space<vmem>>, vector<8x16xf32>
    %9 = arith.mulf %8, %8 : vector<8x16xf32>
    %cst = arith.constant dense<0.000000e+00> : vector<8xf32>
    %10 = vector.multi_reduction <add>, %9, %cst [1] : vector<8x16xf32> to vector<8xf32>
    %11 = vector.shape_cast %10 : vector<8xf32> to vector<8x1xf32>
    %c0_9 = arith.constant 0 : index
    %c0_10 = arith.constant 0 : index
    %c0_11 = arith.constant 0 : index
    %12 = vector.load %arg6[%c0_9, %c0_10, %c0_11] : memref<2x48x32xbf16, #tpu.memory_space<vmem>>, vector<1x48x32xbf16>
    %13 = vector.shape_cast %12 : vector<1x48x32xbf16> to vector<48x32xbf16>
    %c1_12 = arith.constant 1 : index
    %c0_13 = arith.constant 0 : index
    %c0_14 = arith.constant 0 : index
    %14 = vector.load %arg6[%c1_12, %c0_13, %c0_14] : memref<2x48x32xbf16, #tpu.memory_space<vmem>>, vector<1x48x32xbf16>
    %15 = vector.shape_cast %14 : vector<1x48x32xbf16> to vector<48x32xbf16>
    %c0_15 = arith.constant 0 : index
    %c0_16 = arith.constant 0 : index
    %16 = vector.load %arg8[%c0_15, %c0_16] : memref<32x96xbf16, #tpu.memory_space<vmem>>, vector<32x96xbf16>
    %c0_17 = arith.constant 0 : index
    %c0_18 = arith.constant 0 : index
    %17 = vector.load %arg9[%c0_17, %c0_18] : memref<32x96xbf16, #tpu.memory_space<vmem>>, vector<32x96xbf16>
    %c0_19 = arith.constant 0 : index
    %c0_20 = arith.constant 0 : index
    %18 = vector.load %arg11[%c0_19, %c0_20] : memref<32x96xbf16, #tpu.memory_space<vmem>>, vector<32x96xbf16>
    %c0_21 = arith.constant 0 : index
    %c0_22 = arith.constant 0 : index
    %c0_23 = arith.constant 0 : index
    %19 = vector.load %arg7[%c0_21, %c0_22, %c0_23] : memref<2x1x32xf32, #tpu.memory_space<vmem>>, vector<1x1x32xf32>
    %20 = vector.shape_cast %19 : vector<1x1x32xf32> to vector<1x32xf32>
    %21 = vector.shape_cast %20 : vector<1x32xf32> to vector<1x32xf32>
    %22 = vector.broadcast %21 : vector<1x32xf32> to vector<8x32xf32>
    %c1_24 = arith.constant 1 : index
    %c0_25 = arith.constant 0 : index
    %c0_26 = arith.constant 0 : index
    %23 = vector.load %arg7[%c1_24, %c0_25, %c0_26] : memref<2x1x32xf32, #tpu.memory_space<vmem>>, vector<1x1x32xf32>
    %24 = vector.shape_cast %23 : vector<1x1x32xf32> to vector<1x32xf32>
    %25 = vector.shape_cast %24 : vector<1x32xf32> to vector<1x32xf32>
    %26 = vector.broadcast %25 : vector<1x32xf32> to vector<8x32xf32>
    %c0_27 = arith.constant 0 : index
    %c0_28 = arith.constant 0 : index
    %27 = vector.load %arg10[%c0_27, %c0_28] : memref<1x96xf32, #tpu.memory_space<vmem>>, vector<1x96xf32>
    %28 = vector.shape_cast %27 : vector<1x96xf32> to vector<1x96xf32>
    %29 = vector.broadcast %28 : vector<1x96xf32> to vector<8x96xf32>
    %c0_29 = arith.constant 0 : index
    %c0_30 = arith.constant 0 : index
    %30 = vector.load %arg12[%c0_29, %c0_30] : memref<1x96xf32, #tpu.memory_space<vmem>>, vector<1x96xf32>
    %31 = vector.shape_cast %30 : vector<1x96xf32> to vector<1x96xf32>
    %32 = vector.broadcast %31 : vector<1x96xf32> to vector<8x96xf32>
    %c0_31 = arith.constant 0 : index
    %c0_32 = arith.constant 0 : index
    %33 = vector.load %arg3[%c0_31, %c0_32] : memref<8x32xf32, #tpu.memory_space<vmem>>, vector<8x32xf32>
    %34 = arith.mulf %33, %33 : vector<8x32xf32>
    %cst_33 = arith.constant dense<0.000000e+00> : vector<8xf32>
    %35 = vector.multi_reduction <add>, %34, %cst_33 [1] : vector<8x32xf32> to vector<8xf32>
    %36 = vector.shape_cast %35 : vector<8xf32> to vector<8x1xf32>
    %37 = arith.addf %36, %11 : vector<8x1xf32>
    %cst_34 = arith.constant 1.000000e-24 : f32
    %38 = vector.broadcast %cst_34 : f32 to vector<8x1xf32>
    %39 = arith.maximumf %37, %38 : vector<8x1xf32>
    %40 = math.rsqrt %39 : vector<8x1xf32>
    %41 = vector.broadcast %0 : f32 to vector<8x1xf32>
    %42 = arith.mulf %41, %40 : vector<8x1xf32>
    %43 = vector.broadcast %42 : vector<8x1xf32> to vector<8x32xf32>
    %44 = arith.mulf %33, %43 : vector<8x32xf32>
    %45 = vector.broadcast %42 : vector<8x1xf32> to vector<8x16xf32>
    %46 = arith.mulf %8, %45 : vector<8x16xf32>
    %47 = tpu.concatenate %44, %46 in 1 : vector<8x32xf32>, vector<8x16xf32> -> vector<8x48xf32>
    %48 = arith.truncf %47 : vector<8x48xf32> to vector<8x48xbf16>
    %cst_35 = arith.constant dense<0.000000e+00> : vector<8x48xf32>
    %49 = tpu.matmul %5, %48, %cst_35 {dimension_numbers = #tpu.dot_dimension_numbers<[1], [0], [0], [1], [0, 0, 1, 1], [], []>} : vector<8x8xbf16>, vector<8x48xbf16>, vector<8x48xf32> -> vector<8x48xf32>
    %cst_36 = arith.constant dense<0.000000e+00> : vector<8x48xf32>
    %50 = tpu.matmul %7, %48, %cst_36 {dimension_numbers = #tpu.dot_dimension_numbers<[1], [0], [0], [1], [0, 0, 1, 1], [], []>} : vector<8x8xbf16>, vector<8x48xbf16>, vector<8x48xf32> -> vector<8x48xf32>
    %c0_37 = arith.constant 0 : index
    %c0_38 = arith.constant 0 : index
    %c0_39 = arith.constant 0 : index
    %c0_40 = arith.constant 0 : index
    %51 = vector.load %arg5[%c0_37, %c0_38, %c0_39, %c0_40] : memref<1x2x8x48xf32, #tpu.memory_space<vmem>>, vector<1x1x8x48xf32>
    %52 = vector.shape_cast %51 : vector<1x1x8x48xf32> to vector<8x48xf32>
    %53 = vector.broadcast %3 : f32 to vector<8x48xf32>
    %54 = arith.mulf %53, %52 : vector<8x48xf32>
    %55 = arith.addf %49, %54 : vector<8x48xf32>
    %56 = arith.truncf %55 : vector<8x48xf32> to vector<8x48xbf16>
    %c0_41 = arith.constant 0 : index
    %c1_42 = arith.constant 1 : index
    %c0_43 = arith.constant 0 : index
    %c0_44 = arith.constant 0 : index
    %57 = vector.load %arg5[%c0_41, %c1_42, %c0_43, %c0_44] : memref<1x2x8x48xf32, #tpu.memory_space<vmem>>, vector<1x1x8x48xf32>
    %58 = vector.shape_cast %57 : vector<1x1x8x48xf32> to vector<8x48xf32>
    %59 = vector.broadcast %3 : f32 to vector<8x48xf32>
    %60 = arith.mulf %59, %58 : vector<8x48xf32>
    %61 = arith.addf %50, %60 : vector<8x48xf32>
    %62 = arith.truncf %61 : vector<8x48xf32> to vector<8x48xbf16>
    %cst_45 = arith.constant dense<0.000000e+00> : vector<8x32xf32>
    %63 = tpu.matmul %56, %13, %cst_45 {dimension_numbers = #tpu.dot_dimension_numbers<[1], [0], [0], [1], [0, 0, 1, 1], [], []>} : vector<8x48xbf16>, vector<48x32xbf16>, vector<8x32xf32> -> vector<8x32xf32>
    %64 = arith.addf %63, %22 : vector<8x32xf32>
    %cst_46 = arith.constant dense<0.000000e+00> : vector<8x32xf32>
    %65 = tpu.matmul %62, %15, %cst_46 {dimension_numbers = #tpu.dot_dimension_numbers<[1], [0], [0], [1], [0, 0, 1, 1], [], []>} : vector<8x48xbf16>, vector<48x32xbf16>, vector<8x32xf32> -> vector<8x32xf32>
    %66 = arith.addf %65, %26 : vector<8x32xf32>
    %67 = arith.truncf %64 : vector<8x32xf32> to vector<8x32xbf16>
    %cst_47 = arith.constant dense<0.000000e+00> : vector<8x96xf32>
    %68 = tpu.matmul %67, %16, %cst_47 {dimension_numbers = #tpu.dot_dimension_numbers<[1], [0], [0], [1], [0, 0, 1, 1], [], []>} : vector<8x32xbf16>, vector<32x96xbf16>, vector<8x96xf32> -> vector<8x96xf32>
    %69 = arith.truncf %66 : vector<8x32xf32> to vector<8x32xbf16>
    %cst_48 = arith.constant dense<0.000000e+00> : vector<8x96xf32>
    %70 = tpu.matmul %69, %17, %cst_48 {dimension_numbers = #tpu.dot_dimension_numbers<[1], [0], [0], [1], [0, 0, 1, 1], [], []>} : vector<8x32xbf16>, vector<32x96xbf16>, vector<8x96xf32> -> vector<8x96xf32>
    %71 = arith.addf %68, %70 : vector<8x96xf32>
    %72 = arith.addf %71, %29 : vector<8x96xf32>
    %73 = arith.truncf %44 : vector<8x32xf32> to vector<8x32xbf16>
    %cst_49 = arith.constant dense<0.000000e+00> : vector<8x96xf32>
    %74 = tpu.matmul %73, %18, %cst_49 {dimension_numbers = #tpu.dot_dimension_numbers<[1], [0], [0], [1], [0, 0, 1, 1], [], []>} : vector<8x32xbf16>, vector<32x96xbf16>, vector<8x96xf32> -> vector<8x96xf32>
    %75 = arith.addf %74, %32 : vector<8x96xf32>
    %76 = vector.extract_strided_slice %72 {offsets = [0, 0], sizes = [8, 32], strides = [1, 1]} : vector<8x96xf32> to vector<8x32xf32>
    %77 = vector.extract_strided_slice %75 {offsets = [0, 0], sizes = [8, 32], strides = [1, 1]} : vector<8x96xf32> to vector<8x32xf32>
    %78 = arith.addf %76, %77 : vector<8x32xf32>
    %79 = arith.negf %78 : vector<8x32xf32>
    %80 = math.exp %79 : vector<8x32xf32>
    %cst_50 = arith.constant 1.000000e+00 : f32
    %81 = vector.broadcast %cst_50 : f32 to vector<8x32xf32>
    %82 = arith.addf %81, %80 : vector<8x32xf32>
    %83 = arith.divf %81, %82 : vector<8x32xf32>
    %84 = vector.extract_strided_slice %72 {offsets = [0, 64], sizes = [8, 32], strides = [1, 1]} : vector<8x96xf32> to vector<8x32xf32>
    %85 = vector.extract_strided_slice %75 {offsets = [0, 64], sizes = [8, 32], strides = [1, 1]} : vector<8x96xf32> to vector<8x32xf32>
    %86 = arith.mulf %83, %85 : vector<8x32xf32>
    %87 = arith.addf %84, %86 : vector<8x32xf32>
    %88 = math.tanh %87 : vector<8x32xf32>
    %89 = vector.extract_strided_slice %72 {offsets = [0, 32], sizes = [8, 32], strides = [1, 1]} : vector<8x96xf32> to vector<8x32xf32>
    %90 = vector.extract_strided_slice %75 {offsets = [0, 32], sizes = [8, 32], strides = [1, 1]} : vector<8x96xf32> to vector<8x32xf32>
    %91 = arith.addf %89, %90 : vector<8x32xf32>
    %92 = arith.negf %91 : vector<8x32xf32>
    %93 = math.exp %92 : vector<8x32xf32>
    %cst_51 = arith.constant 1.000000e+00 : f32
    %94 = vector.broadcast %cst_51 : f32 to vector<8x32xf32>
    %95 = arith.addf %94, %93 : vector<8x32xf32>
    %96 = arith.divf %94, %95 : vector<8x32xf32>
    %97 = arith.subf %88, %44 : vector<8x32xf32>
    %98 = arith.mulf %96, %97 : vector<8x32xf32>
    %99 = arith.addf %44, %98 : vector<8x32xf32>
    %c0_52 = arith.constant 0 : index
    %c0_53 = arith.constant 0 : index
    %100 = vector.load %arg13[%c0_52, %c0_53] : memref<8x32xf32, #tpu.memory_space<vmem>>, vector<8x32xf32>
    tpu.vector_store %arg13[%c0_52, %c0_53], %99 {strides = array<i32>} : memref<8x32xf32, #tpu.memory_space<vmem>>, vector<8x32xf32>,
    return
  }
  func.func @transform_0(%arg0: i32) -> i32 {
    %c0_i32 = arith.constant 0 : i32
    %c0_i32_0 = arith.constant 0 : i32
    return %c0_i32 : i32
  }
  func.func @transform_1(%arg0: i32) -> (i32, i32, i32) {
    %c0_i32 = arith.constant 0 : i32
    %c0_i32_0 = arith.constant 0 : i32
    %c0_i32_1 = arith.constant 0 : i32
    return %c0_i32, %arg0, %c0_i32_0 : i32, i32, i32
  }
  func.func @transform_2(%arg0: i32) -> (i32, i32) {
    %c0_i32 = arith.constant 0 : i32
    %c0_i32_0 = arith.constant 0 : i32
    return %arg0, %c0_i32 : i32, i32
  }
  func.func @transform_3(%arg0: i32) -> (i32, i32) {
    %c0_i32 = arith.constant 0 : i32
    %c0_i32_0 = arith.constant 0 : i32
    return %arg0, %c0_i32 : i32, i32
  }
  func.func @transform_4(%arg0: i32) -> (i32, i32, i32, i32) {
    %c0_i32 = arith.constant 0 : i32
    %c0_i32_0 = arith.constant 0 : i32
    %c0_i32_1 = arith.constant 0 : i32
    %c0_i32_2 = arith.constant 0 : i32
    return %c0_i32, %c0_i32_0, %arg0, %c0_i32_1 : i32, i32, i32, i32
  }
  func.func @transform_5(%arg0: i32) -> (i32, i32, i32) {
    %c0_i32 = arith.constant 0 : i32
    %c0_i32_0 = arith.constant 0 : i32
    %c0_i32_1 = arith.constant 0 : i32
    %c0_i32_2 = arith.constant 0 : i32
    return %c0_i32, %c0_i32_0, %c0_i32_1 : i32, i32, i32
  }
  func.func @transform_6(%arg0: i32) -> (i32, i32, i32) {
    %c0_i32 = arith.constant 0 : i32
    %c0_i32_0 = arith.constant 0 : i32
    %c0_i32_1 = arith.constant 0 : i32
    %c0_i32_2 = arith.constant 0 : i32
    return %c0_i32, %c0_i32_0, %c0_i32_1 : i32, i32, i32
  }
  func.func @transform_7(%arg0: i32) -> (i32, i32) {
    %c0_i32 = arith.constant 0 : i32
    %c0_i32_0 = arith.constant 0 : i32
    %c0_i32_1 = arith.constant 0 : i32
    return %c0_i32, %c0_i32_0 : i32, i32
  }
  func.func @transform_8(%arg0: i32) -> (i32, i32) {
    %c0_i32 = arith.constant 0 : i32
    %c0_i32_0 = arith.constant 0 : i32
    %c0_i32_1 = arith.constant 0 : i32
    return %c0_i32, %c0_i32_0 : i32, i32
  }
  func.func @transform_9(%arg0: i32) -> (i32, i32) {
    %c0_i32 = arith.constant 0 : i32
    %c0_i32_0 = arith.constant 0 : i32
    %c0_i32_1 = arith.constant 0 : i32
    return %c0_i32, %c0_i32_0 : i32, i32
  }
  func.func @transform_10(%arg0: i32) -> (i32, i32) {
    %c0_i32 = arith.constant 0 : i32
    %c0_i32_0 = arith.constant 0 : i32
    %c0_i32_1 = arith.constant 0 : i32
    return %c0_i32, %c0_i32_0 : i32, i32
  }
  func.func @transform_11(%arg0: i32) -> (i32, i32) {
    %c0_i32 = arith.constant 0 : i32
    %c0_i32_0 = arith.constant 0 : i32
    %c0_i32_1 = arith.constant 0 : i32
    return %c0_i32, %c0_i32_0 : i32, i32
  }
  func.func @transform_12(%arg0: i32) -> (i32, i32) {
    %c0_i32 = arith.constant 0 : i32
    %c0_i32_0 = arith.constant 0 : i32
    return %arg0, %c0_i32 : i32, i32
  }
}

</mosaic_0001>

<bundles_post_ra>
// kernel: sequence_graph_forward.1
= control target key start
LH: loop header
LB: loop body
LE: loop exit
PB: predicated region body
PF: predicated region fallthrough
CT: control target
= control target key end

     0   :  { %s1692_s0 = inlined_call_operand.vmem [shape: f32[2], index: 0, kind: input, shape index: {}]   ;;  %s1693_s1 = inlined_call_operand.vmem [shape: bf16[2,16,8], index: 1, kind: input, shape index: {}]   ;;  %s1694_s2 = inlined_call_operand.vmem [shape: f32[16,32], index: 2, kind: input, shape index: {}, may-alias: {2,12}]   ;;  %s1695_s3 = inlined_call_operand.vmem [shape: f32[16,16], index: 3, kind: input, shape index: {}]   ;;  %s1696_s4 = inlined_call_operand.vmem [shape: f32[1,2,16,48], index: 4, kind: input, shape index: {}]   ;;  %s1697_s5 = inlined_call_operand.vmem [shape: bf16[2,48,32], index: 5, kind: input, shape index: {}]   ;;  %s1698_s6 = inlined_call_operand.vmem [shape: f32[2,1,32], index: 6, kind: input, shape index: {}]   ;;  %s1699_s7 = inlined_call_operand.vmem [shape: bf16[32,96], index: 7, kind: input, shape index: {}]   ;;  %s1700_s8 = inlined_call_operand.vmem [shape: bf16[32,96], index: 8, kind: input, shape index: {}]   ;;  %s1701_s9 = inlined_call_operand.vmem [shape: f32[1,96], index: 9, kind: input, shape index: {}]   ;;  %s1702_s10 = inlined_call_operand.vmem [shape: bf16[32,96], index: 10, kind: input, shape index: {}]   ;;  %s1703_s11 = inlined_call_operand.vmem [shape: f32[1,96], index: 11, kind: input, shape index: {}]   ;;  %s1704_s12 = inlined_call_operand.vmem [shape: f32[16,32], index: 12, kind: output, shape index: {}, may-alias: {2,12}]  }
   0x1   :  { %1705 = sst [smem:[#allocation8_spill]] %s1692_s0 }
   0x2   :  { %17 = vsyncpa [#allocation3], 0  ;;  %s1493_s21 = smov 0   ;;  %s1495_s22 = smov 0  }
   0x3   :  { %s1497_s23 = smov 0  }
   0x4 LB: > { %s1509_s24 = sadd.s32 4294967295, %s1420_s23   ;;  %s1512_s25 = sadd.s32 1, %s1420_s23   ;;  %s1420_s23 = sphi %s1497_s23, %s1713_s23   ;;  %s1416_s22 = sphi %s1495_s22, %s1712_s22   ;;  %s1412_s21 = sphi %s1493_s21, %s1711_s21  }
   0x5   : > { %s48_s26 = ssub.s32 %s1420_s23, %s1512_s25  ;;  %s51_s27 = sadd.s32 1, %s1416_s22 }
   0x6   : > { %p49_p0 = scmp.eq.s32.totalorder %s48_s26, 0  ;;  %p58_p1 = scmp.ne.s32.totalorder %s1416_s22, %s1412_s21 }
   0x7   : > { %p59_p2 = scmp.eq.s32.totalorder %s1420_s23, 0  ;;  %p1192_p3 = scmp.ge.s32.totalorder %s1420_s23, 1 }
   0x8   : > { %s1522_s28 = scalar_select %p49_p0, %s1416_s22, %s51_s27  }
   0x9   : > { %p1524_p4 = por %p59_p2, %p58_p1  ;;  %p326_p5 = scmp.lt.s32.totalorder %s1420_s23, 3 }
   0xa   : > { %1706 = sst [smem:[#allocation7_spill]] %s1522_s28  ;;  %p1327_p6 = scmp.eq.s32.totalorder %s1509_s24, 0 }
   0xb   : > { %p1530_p7 = pnand %p1192_p3, %p326_p5  ;;  %s1709_s0 = sld [smem:[#allocation8_spill]] }
   0xd   : > { %p1323_p8 = pneg %p1530_p7 }
   0xf   : > { %p1324_p9 = pnand %p1327_p6, %p1323_p8 }
  0x11   : > { %s339_s15 = sshll.u32 %s1709_s0, 4  ;;  %p1381_p11 = pneg %p1324_p9  ;;  %s340_s15 = int_to_ptr.vmem [resolvable:$true] %s339_s15 }
  0x12   : > { %s1379_s16 = scalar_lea.vmem %s340_s15, 16  ;;  %p1387_p0 = scmp.lt.s32.totalorder %s340_s15, %s340_s15 }
  0x13   : > { %p1380_p10 = scmp.ne.s32.totalorder %s340_s15, %s1379_s16  ;;  %p1388_p1 = scmp.lt.s32.totalorder %s1379_s16, %s1379_s16 }
  0x15   : > { %p1382_p12 = pnand %p1381_p11, %p1380_p10  ;;  %p1389_p2 = por %p1388_p1, %p1387_p0 }
  0x17   : > { %p1383_p13 = pneg %p1382_p12 }
  0x19   : > { %p1390_p3 = pnand %p1389_p2, %p1383_p13 }
  0x1b   : > { %1393 = shalt.err (!%p1390_p3)
}
  0x1c   : > { %s1422_s17 = smov [#allocation2]   ;;  %p1194_p5 = scmp.ge.s32.totalorder %s1420_s23, 2 }
  0x1d   : > { %1326 = dma.vmem_to_smem (!%p1324_p9), %s340_s15, 16, %s1422_s17, [#allocation3]  }
  0x1e   : > { %367 = sbr.rel (%p1194_p5) target bundleno = 45 (0x2d), region = 48 }
  0x23   : > { %370 = sbr.rel (!%p1524_p4) target bundleno = 40 (0x28), region = 52  ;;  %s372_s18 = sand.u32 (%p1524_p4), 1, %s1416_s22  }
  0x24   : > { %s1196_s19 = sshll.u32 (%p1524_p4), %s1420_s23, 2  ;;  %s1195_s20 = sshll.u32 (%p1524_p4), %s372_s18, 3 }
  0x25   : > { %s376_s13 = scalar_lea.vmem (%p1524_p4), %s1693_s1, %s1196_s19  ;;  %s374_s14 = scalar_lea.vmem (%p1524_p4), [#allocation4], %s1195_s20 }
  0x26   : > { %v393_v0 = vld [vmem:[%s376_s13] sm:$0xf] (%p1524_p4)  ;;  %v395_v1 = vld [vmem:[%s376_s13 + $0x8] sm:$0xf] (%p1524_p4) }
  0x27   : > { %394 = vst [vmem:[%s374_s14] sm:$0xf] (%p1524_p4), %v393_v0  ;;  %396 = vst [vmem:[%s374_s14 + $0x4] sm:$0xf] (%p1524_p4), %v395_v1 }
  0x28 PF: > { %438 = sbr.rel (!%p1524_p4) target bundleno = 45 (0x2d), region = 101  ;;  %s440_s15 = sand.u32 (%p1524_p4), 1, %s1416_s22  }
  0x29   : > { %s1198_s16 = sshll.u32 (%p1524_p4), %s1420_s23, 3  ;;  %s1197_s17 = sshll.u32 (%p1524_p4), %s440_s15, 4 }
  0x2a   : > { %s444_s28 = scalar_lea.vmem (%p1524_p4), %s1696_s4, %s1198_s16  ;;  %s442_s19 = scalar_lea.vmem (%p1524_p4), [#allocation5], %s1197_s17 }
  0x2b   : > { %v475_v2 = vld [vmem:[%s444_s28] sm:$0xff] (%p1524_p4)  ;;  %v477_v3 = vld [vmem:[%s444_s28 + $0x10] sm:$0xff] (%p1524_p4) }
  0x2c   : > { %476 = vst [vmem:[%s442_s19] sm:$0xff] (%p1524_p4), %v475_v2  ;;  %478 = vst [vmem:[%s442_s19 + $0x8] sm:$0xff] (%p1524_p4), %v477_v3 }
  0x2d PF: > { %487 = sbr.rel (%p1530_p7) target bundleno = 1432 (0x598), region = 139 }
  0x32   : > { %1407 = dma.done.wait (%p1327_p6), [#allocation3], 16  }
  0x33   : > { %1409 = vsyncadd (%p1327_p6), [#allocation3], 4294967280  ;;  %s494_s23 = sand.u32 1, %s1412_s21  }
  0x34   : > { %s1563_s0 = sshll.u32 %s494_s23, 3  ;;  %s1565_s28 = sshll.u32 %s494_s23, 4 }
  0x35   : > { %s496_s29 = scalar_lea.vmem [#allocation4], %s1563_s0  ;;  %s503_s20 = scalar_lea.vmem [#allocation5], %s1565_s28 }
  0x36   : > { %507 = sfence }
  0x37   : > { %p554_p4 = scmp.lt.s32.totalorder %s1509_s24, 1  ;;  %vm575_vm0 = vcmask 130048   ;;  %vm635_vm1 = vcmask 261120   ;;  %v1423_v14 = vmov 0.0   ;;  %vm1424_vm2 = vmmov 0   ;;  %s1425_s16 = smov 32  }
  0x38   : > { %1263 = vmatprep.subr.bf16.mxu0 %v1423_v14  ;;  %1269 = vmatprep.subr.bf16.mxu1 %v1423_v14  ;;  %vm659_vm3 = vcmask 1043456   ;;  %v570_v24 = vld [vmem:[%s496_s29] sm:$0xf]  ;;  %vm655_vm4 = vcmask 64512   ;;  %v1207_v25 = vld [vmem:[%s496_s29 + $0x4] sm:$0xf] }
  0x39   : > { %s1715_s24 = smov (!%p554_p4, %s1509_s24), 1  ;;  %1265 = vmatprep.mubr.msk.bf16.mxu0 %vm1424_vm2, %v1423_v14  ;;  %1271 = vmatprep.mubr.msk.bf16.mxu1 %vm1424_vm2, %v1423_v14  ;;  %v1359_v26 = vld [vmem:[%s1697_s5 + $0x10] sm:$0xff]   ;;  %v1360_v27 = vld [vmem:[%s1697_s5 + $0x28] sm:$0xff]   ;;  %v1362_v29 = vld [vmem:[%s1697_s5 + $0x20] sm:$0xff]   ;;  %vm769_vm5 = vcmask 392192   ;;  %s1426_s19 = smov 64  }
  0x3a   : > { %s1571_s30 = sshll.u32 %s1715_s24, 3  ;;  %s567_s24 = sld [smem:[#allocation2]]  ;;  %v1361_v28 = vld [vmem:[%s1697_s5 + $0x8] sm:$0xff]   ;;  %v1363_v30 = vld [vmem:[%s1697_s5] sm:$0xff]   ;;  %v1364_v31 = vld [vmem:[%s1697_s5 + $0x18] sm:$0xff]  }
  0x3b   : > { %s561_s21 = scalar_lea.vmem %s1695_s3, %s1571_s30  ;;  %s557_s15 = scalar_lea.vmem %s1694_s2, %s1571_s30  ;;  %v652_v32 = vld [vmem:[%s503_s20] sm:$0xff]  ;;  %v1220_v34 = vld [vmem:[%s503_s20 + $0x8] sm:$0xff] }
  0x3c   : > { %v573_v4 = vld [vmem:[%s561_s21] sm:$0xff]  ;;  %v1365_v43 = vld [vmem:[%s1700_s8 + $0x8] sm:$0xff]   ;;  %s1427_s20 = smov 96   ;;  %s565_s0 = scalar_lea.vmem %s1704_s12, %s1571_s30 }
  0x3d   : > { %v574_v5 = vmul.f32 %v573_v4, %v573_v4  ;;  %v633_v6 = vld [vmem:[%s557_s15] sm:$0xff]  ;;  %v1366_v44 = vld [vmem:[%s1699_s7 + $0x8] sm:$0xff]  }
  0x3e   : > { %v634_v7 = vmul.f32 %v633_v6, %v633_v6  ;;  %v1367_v51 = vld [vmem:[%s1700_s8] sm:$0xff]   ;;  %v1369_v60 = vld [vmem:[%s1702_s10 + $0x8] sm:$0xff]  }
  0x3f   : > { %v576_v8 = vsel %vm575_vm0, %v574_v5, 0.0  ;;  %v1368_v52 = vld [vmem:[%s1699_s7] sm:$0xff]  }
  0x40   : > { %577 = vadd.xlane.f32.xlu0 %v576_v8  ;;  %v636_v9 = vsel %vm635_vm1, %v634_v7, 0.0  ;;  %v642_v15 = vstv %s567_s24  ;;  %s1206_s24 = sld [smem:[#allocation2 + $0x1]]  ;;  %v1214_v53 = vld [vmem:[%s1698_s6] ss:$0 sm:$0xff]  ;;  %v1216_v54 = vld [vmem:[%s1698_s6 + $0x1] ss:$0 sm:$0xff] }
  0x41   : > { %v1370_v3 = vld [vmem:[%s1702_s10] sm:$0xff]  }
  0x44   : > { %637 = vadd.xlane.f32.xlu0 %v636_v9 }
  0xc9   : > { %v578_v10 = vpop.xlane.xlu0 %577 }
  0xcd   : > { %v638_v11 = vpop.xlane.xlu0 %637 }
  0xce   : > { %v639_v12 = vadd.f32 %v638_v11, %v578_v10 }
  0xd0   : > { %v640_v13 = vmax.f32 %v639_v12, 1e-24 }
  0xd2   : > { %1371 = vrsqrt.f32 %v640_v13 }
  0xdf   : > { %v1372_v16 = vpop.eup %1371 }
  0xe0   : > { %v643_v17 = vmul.f32 %v1372_v16, %v642_v15  ;;  %v1218_v15 = vld [vmem:[%s1703_s11] ss:$0 sm:$0xff] }
  0xe2   : > { %v645_v18 = vmul.f32 %v643_v17, %v573_v4  ;;  %v1588_v19 = vmul.f32 %v643_v17, %v633_v6 }
  0xe4   : > { %647 = vrot.lane.b32.xlu1 %v645_v18, %s1425_s16  ;;  %s569_s16 = smul.f32 %s1206_s24, %s1206_s24  ;;  %v987_v5 = vpack.c.bf16 %v1588_v19, %v1588_v19 }
  0xe6   : > { %v653_v33 = vstv %s569_s16 }
  0xe7   : > { %v654_v35 = vmul.f32 %v653_v33, %v652_v32  ;;  %v706_v36 = vmul.f32 %v1220_v34, %v653_v33 }
 0x156   : > { %v648_v20 = vpop.permute.xlu1 %647 }
 0x157   : > { %v650_v21 = vsel %vm635_vm1, %v1588_v19, %v648_v20 }
 0x158   : > { %v651_v22 = vpack.c.bf16 %v650_v21, %v650_v21 }
 0x15a   : > { %v661_v23 = vsel %vm659_vm3, %v651_v22, 0  ;;  %v1217_v22 = vld [vmem:[%s1701_s9] ss:$0 sm:$0xff] }
 0x15b   : > { %1264 = vmatpush3.bf16.msra.mxu0 %v661_v23  ;;  %1270 = vmatpush3.bf16.msra.mxu1 %v661_v23 }
 0x15c   : > { %1275 = vmatprep.subr.bf16.mxu0 %v1423_v14  ;;  %1285 = vmatprep.subr.bf16.mxu1 %v1423_v14 }
 0x15e   : > { %1266 = vmatmul.mubr.msk.bf16.vlgmr.msra.gmra.mxu0 %vm655_vm4, %v570_v24  ;;  %1272 = vmatmul.mubr.msk.bf16.vlgmr.msra.gmra.mxu1 %vm655_vm4, %v1207_v25 }
 0x15f   : > { %1276 = vmatpush3.bf16.msra.mxu0 %v1359_v26  ;;  %1286 = vmatpush3.bf16.msra.mxu1 %v1360_v27 }
 0x160   : > { %1277 = vmatprep.subr.bf16.mxu0 %v1423_v14  ;;  %1287 = vmatprep.subr.bf16.mxu1 %v1423_v14 }
 0x161   : > { %1281 = vmatprep.mubr.msk.bf16.mxu0 %vm1424_vm2, %v1423_v14  ;;  %1291 = vmatprep.mubr.msk.bf16.mxu1 %vm1424_vm2, %v1423_v14 }
 0x163   : > { %1278 = vmatpush3.bf16.msra.mxu0 %v1361_v28  ;;  %1288 = vmatpush3.bf16.msra.mxu1 %v1362_v29 }
 0x164   : > { %1279 = vmatprep.subr.bf16.mxu0 %v1423_v14  ;;  %1289 = vmatprep.subr.bf16.mxu1 %v1423_v14 }
 0x167   : > { %1280 = vmatpush3.bf16.msra.mxu0 %v1363_v30  ;;  %1290 = vmatpush3.bf16.msra.mxu1 %v1364_v31 }
 0x168   : > { %1295 = vmatprep.subr.bf16.mxu0 %v1423_v14  ;;  %1303 = vmatprep.subr.bf16.mxu1 %v1423_v14 }
 0x21e   : > { %v697_v37 = vpop.f32.mrf.mxu0  ;;  %v744_v38 = vpop.f32.mrf.mxu1 }
 0x21f   : > { %v698_v39 = vadd.f32 %v697_v37, %v654_v35  ;;  %v745_v40 = vadd.f32 %v744_v38, %v706_v36 }
 0x220   : > { %v1273_v41 = vpop.f32.mrf.mxu1  ;;  %v1267_v42 = vpop.f32.mrf.mxu0 }
 0x221   : > { %v703_v45 = vpack.c.bf16 %v698_v39, %v698_v39  ;;  %v750_v46 = vpack.c.bf16 %v745_v40, %v745_v40 }
 0x222   : > { %v747_v47 = vpop.f32.mrf.mxu1  ;;  %v700_v48 = vpop.f32.mrf.mxu0 }
 0x223   : > { %1282 = vmatmul.mubr.msk.bf16.vlgmr.msra.gmra.mxu0 %vm769_vm5, %v703_v45  ;;  %1292 = vmatmul.mubr.msk.bf16.vlgmr.msra.gmra.mxu1 %vm769_vm5, %v750_v46 }
 0x224   : > { %v1274_v49 = vpop.f32.mrf.mxu1  ;;  %v1268_v50 = vpop.f32.mrf.mxu0  ;;  %1296 = vmatpush3.bf16.msra.mxu0 %v1365_v43  ;;  %1304 = vmatpush3.bf16.msra.mxu1 %v1366_v44 }
 0x225   : > { %1297 = vmatprep.subr.bf16.mxu0 %v1423_v14  ;;  %1305 = vmatprep.subr.bf16.mxu1 %v1423_v14 }
 0x226   : > { %1299 = vmatprep.mubr.msk.bf16.mxu0 %vm1424_vm2, %v1423_v14  ;;  %1307 = vmatprep.mubr.msk.bf16.mxu1 %vm1424_vm2, %v1423_v14 }
 0x228   : > { %1298 = vmatpush3.bf16.msra.mxu0 %v1367_v51  ;;  %1306 = vmatpush3.bf16.msra.mxu1 %v1368_v52 }
 0x229   : > { %1311 = vmatprep.subr.bf16.mxu0 %v1423_v14 }
 0x2e3   : > { %v807_v55 = vpop.f32.mrf.mxu0  ;;  %v868_v56 = vpop.f32.mrf.mxu1 }
 0x2e4   : > { %v808_v57 = vadd.f32 %v1214_v53, %v807_v55  ;;  %v869_v58 = vadd.f32 %v1216_v54, %v868_v56 }
 0x2e5   : > { %v1293_v59 = vpop.f32.mrf.mxu1  ;;  %v1283_v61 = vpop.f32.mrf.mxu0 }
 0x2e6   : > { %v874_v62 = vpack.c.bf16 %v808_v57, %v808_v57  ;;  %v875_v63 = vpack.c.bf16 %v869_v58, %v869_v58 }
 0x2e7   : > { %v871_v0 = vpop.f32.mrf.mxu1  ;;  %v810_v1 = vpop.f32.mrf.mxu0 }
 0x2e8   : > { %1300 = vmatmul.mubr.msk.bf16.vlgmr.msra.gmra.mxu0 %vm635_vm1, %v875_v63  ;;  %1308 = vmatmul.mubr.msk.bf16.vlgmr.msra.gmra.mxu1 %vm635_vm1, %v874_v62 }
 0x2e9   : > { %1312 = vmatpush3.bf16.msra.mxu0 %v1369_v60  ;;  %v1294_v2 = vpop.f32.mrf.mxu1  ;;  %1315 = vmatprep.mubr.msk.bf16.mxu0 %vm1424_vm2, %v1423_v14  ;;  %v1284_v4 = vpop.f32.mrf.mxu0 }
 0x2ea   : > { %1313 = vmatprep.subr.bf16.mxu0 %v1423_v14 }
 0x2ed   : > { %1314 = vmatpush3.bf16.msra.mxu0 %v1370_v3 }
 0x2f0   : > { %1316 = vmatmul.mubr.msk.bf16.vlgmr.msra.gmra.mxu0 %vm635_vm1, %v987_v5 }
 0x3a8   : > { %v925_v6 = vpop.f32.mrf.mxu0  ;;  %v980_v7 = vpop.f32.mrf.mxu1 }
 0x3a9   : > { %v981_v8 = vadd.f32 %v980_v7, %v925_v6 }
 0x3aa   : > { %v1301_v9 = vpop.f32.mrf.mxu0  ;;  %v1309_v10 = vpop.f32.mrf.mxu1 }
 0x3ab   : > { %v986_v23 = vadd.f32 %v1217_v22, %v981_v8 }
 0x3ac   : > { %v928_v11 = vpop.f32.mrf.mxu0  ;;  %v983_v12 = vpop.f32.mrf.mxu1 }
 0x3ae   : > { %v1302_v13 = vpop.f32.mrf.mxu0  ;;  %v1310_v16 = vpop.f32.mrf.mxu1 }
 0x3b0   : > { %v1037_v14 = vpop.f32.mrf.mxu0 }
 0x3b1   : > { %v1038_v17 = vadd.f32 %v1218_v15, %v1037_v14 }
 0x3b2   : > { %v1317_v18 = vpop.f32.mrf.mxu0 }
 0x3b3   : > { %1051 = vrot.lane.b32.xlu1 %v1038_v17, %s1426_s19  ;;  %v1043_v24 = vadd.f32 %v1038_v17, %v986_v23 }
 0x3b4   : > { %v1040_v20 = vpop.f32.mrf.mxu0 }
 0x3b5   : > { %v1239_v25 = vmul.f32 -1.442695, %v1043_v24 }
 0x3b6   : > { %v1318_v21 = vpop.f32.mrf.mxu0 }
 0x3b7   : > { %1062 = vrot.lane.b32.xlu1 %v1588_v19, %s1426_s19  ;;  %1373 = vpow2.f32 %v1239_v25 }
 0x3c4   : > { %v1374_v26 = vpop.eup %1373 }
 0x3c5   : > { %v1047_v27 = vadd.f32 1.0, %v1374_v26 }
 0x3c7   : > { %1375 = vrcp.f32 %v1047_v27 }
 0x3d4   : > { %v1376_v28 = vpop.eup %1375 }
 0x425   : > { %v1052_v29 = vpop.permute.xlu1 %1051 }
 0x426   : > { %v1054_v30 = vmul.f32 %v1376_v28, %v1052_v29 }
 0x428   : > { %1056 = vrot.lane.b32.xlu0 %v1054_v30, %s1426_s19 }
 0x429   : > { %v1063_v34 = vpop.permute.xlu1 %1062 }
 0x49a   : > { %v1057_v31 = vpop.permute.xlu0 %1056 }
 0x49b   : > { %v1059_v32 = vadd.f32 %v1057_v31, %v986_v23 }
 0x49d   : > { %1377 = vtanh.f32 %v1059_v32 }
 0x4aa   : > { %v1378_v33 = vpop.eup %1377 }
 0x4ab   : > { %v1065_v35 = vsub.f32 %v1378_v33, %v1063_v34 }
 0x4ad   : > { %1067 = vrot.lane.b32.xlu1 %v1065_v35, %s1427_s20 }
 0x51f   : > { %v1068_v36 = vpop.permute.xlu1 %1067 }
 0x520   : > { %v1070_v37 = vmul.f32 %v1376_v28, %v1068_v36 }
 0x522   : > { %1072 = vrot.lane.b32.xlu1 %v1070_v37, %s1427_s20 }
 0x594   : > { %v1073_v38 = vpop.permute.xlu1 %1072 }
 0x595   : > { %v1075_v39 = vadd.f32 %v1073_v38, %v1588_v19 }
 0x597   : > { %1076 = vst.msk [vmem:[%s565_s0] sm:$0xff] %vm635_vm1, %v1075_v39 }
 0x598 PF: > { %s1710_s29 = sld [smem:[#allocation7_spill]]  ;;  %p20_p6 = scmp.ge.s32.totalorder %s1512_s25, 4  }
 0x599   : > { %s1711_s21 = smov %s1416_s22  ;;  %s1713_s23 = smov %s1512_s25 }
 0x59a   :  { %22 = sbr.rel (!%p20_p6) target bundleno = 4 (0x4), region = 205 }
 0x59e   : > { %s1712_s22 = smov %s1710_s29 }
 0x59f   :  { %1096 = vsyncpa [#allocation3], 1 }
 0x5a0   :  { %1098 = vsyncpa [#allocation3 + $0x1], 1 }

</bundles_post_ra>
